<compile_context>
chip_gen: v7x
topology: tpu7x:2x2x1
jax: 0.10.0
libtpu: 0.0.40
codegen_flags: <defaults>
</compile_context>

<pallas_src>
import functools

import jax
import jax.numpy as jnp
from jax import lax
from jax.experimental import pallas as pl
from jax.experimental.pallas import tpu as pltpu


def _round_up(x, m):
    return ((x + m - 1) // m) * m


def _linear_kernel_single_k(x_ref, w_ref, b_ref, o_ref, *, precision):
    # x_ref: (tm, K)  w_ref: (tn, K) [PyTorch layout]  b_ref: (1, tn)
    acc = lax.dot_general(
        x_ref[...],
        w_ref[...],
        dimension_numbers=(((1,), (1,)), ((), ())),
        preferred_element_type=jnp.float32,
        precision=precision,
    )
    o_ref[...] = (acc + b_ref[...].astype(jnp.float32)).astype(o_ref.dtype)


def _linear_kernel_multi_k(x_ref, w_ref, b_ref, o_ref, acc_ref, *, precision):
    # x_ref: (tm, tk)  w_ref: (tn, tk)  b_ref: (1, tn)  acc_ref: (tm, tn) f32
    k = pl.program_id(2)

    @pl.when(k == 0)
    def _():
        acc_ref[...] = jnp.zeros_like(acc_ref)

    acc_ref[...] += lax.dot_general(
        x_ref[...],
        w_ref[...],
        dimension_numbers=(((1,), (1,)), ((), ())),
        preferred_element_type=jnp.float32,
        precision=precision,
    )

    @pl.when(k == pl.num_programs(2) - 1)
    def _():
        o_ref[...] = (acc_ref[...] + b_ref[...].astype(jnp.float32)).astype(
            o_ref.dtype
        )


def linear_forward(x, weight, bias, dropout_p=0.0):
    """y = dropout_p(x) @ weight.T + bias   (weight in PyTorch [N, K] layout).

    dropout_p == 0.0 (module default / eval mode) -> identity.
    # TODO(synk): training-mode dropout (p > 0) with on-chip RNG masking is not
    # implemented; the module default p=0.0 makes it a no-op.
    """
    assert dropout_p == 0.0, "only the default p=0.0 (identity dropout) is supported"

    orig_shape = x.shape
    in_features = orig_shape[-1]
    out_features = weight.shape[0]

    # nn.Linear applies to the last axis; flatten leading dims.
    x2d = x.reshape(-1, in_features)
    M, K = x2d.shape
    N = out_features

    precision = (
        lax.Precision.HIGHEST if x.dtype == jnp.float32 else lax.Precision.DEFAULT
    )

    # ---- tile selection (MXU-aligned, clamped for small problems) ----------
    tm = min(256, _round_up(M, 8))      # sublane multiple of 8
    tn = min(256, _round_up(N, 128))    # lane multiple of 128 (lane-dense out)
    tk = min(512, _round_up(K, 128))

    M_pad = _round_up(M, tm)
    N_pad = _round_up(N, tn)
    K_pad = _round_up(K, tk)

    # ---- zero padding (zero K-tail adds nothing to the accumulator) --------
    x_p = x2d
    if (M_pad, K_pad) != (M, K):
        x_p = jnp.pad(x2d, ((0, M_pad - M), (0, K_pad - K)))
    w_p = weight  # [N, K] — no transpose materialized
    if (N_pad, K_pad) != (N, K):
        w_p = jnp.pad(weight, ((0, N_pad - N), (0, K_pad - K)))
    b_p = bias
    if N_pad != N:
        b_p = jnp.pad(bias, (0, N_pad - N))
    b2d = b_p.reshape(1, N_pad)

    if K_pad == tk:
        # ---- single K tile: 2-D grid, no accumulator scratch ---------------
        grid = (M_pad // tm, N_pad // tn)
        kernel = functools.partial(_linear_kernel_single_k, precision=precision)
        grid_spec = pltpu.PrefetchScalarGridSpec(
            num_scalar_prefetch=0,
            grid=grid,
            in_specs=[
                pl.BlockSpec((tm, tk), lambda i, j: (i, 0)),   # x tile
                pl.BlockSpec((tn, tk), lambda i, j: (j, 0)),   # W tile [N,K]
                pl.BlockSpec((1, tn), lambda i, j: (0, j)),    # bias tile
            ],
            out_specs=pl.BlockSpec((tm, tn), lambda i, j: (i, j)),
            scratch_shapes=[],
        )
        dim_sem = ("parallel", "parallel")
    else:
        # ---- K reduction: 3-D grid with f32 VMEM accumulator ---------------
        grid = (M_pad // tm, N_pad // tn, K_pad // tk)
        kernel = functools.partial(_linear_kernel_multi_k, precision=precision)
        grid_spec = pltpu.PrefetchScalarGridSpec(
            num_scalar_prefetch=0,
            grid=grid,
            in_specs=[
                pl.BlockSpec((tm, tk), lambda i, j, k: (i, k)),   # x tile
                pl.BlockSpec((tn, tk), lambda i, j, k: (j, k)),   # W tile [N,K]
                pl.BlockSpec((1, tn), lambda i, j, k: (0, j)),    # bias tile
            ],
            out_specs=pl.BlockSpec((tm, tn), lambda i, j, k: (i, j)),
            scratch_shapes=[pltpu.VMEM((tm, tn), jnp.float32)],
        )
        dim_sem = ("parallel", "parallel", "arbitrary")

    out = pl.pallas_call(
        kernel,
        out_shape=jax.ShapeDtypeStruct((M_pad, N_pad), x.dtype),
        grid_spec=grid_spec,
        compiler_params=pltpu.CompilerParams(
            dimension_semantics=dim_sem,
            vmem_limit_bytes=32 * 1024 * 1024,
        ),
    )(x_p, w_p, b2d)

    out = out[:M, :N]
    return out.reshape(*orig_shape[:-1], N)


if __name__ == "__main__":
    key = jax.random.PRNGKey(0)
    kx, kw, kb = jax.random.split(key, 3)

    batch, seq, in_features, out_features = 2, 8, 32, 16

    x = jax.random.normal(kx, (batch, seq, in_features), dtype=jnp.float32)
    # Deterministic "Kaiming-uniform-like" init matching nn.Linear param shapes.
    bound = 1.0 / (in_features ** 0.5)
    weight = jax.random.uniform(
        kw, (out_features, in_features), minval=-bound, maxval=bound,
        dtype=jnp.float32,
    )
    bias = jax.random.uniform(
        kb, (out_features,), minval=-bound, maxval=bound, dtype=jnp.float32
    )

    y = linear_forward(x, weight, bias)
    jax.block_until_ready(y)

    # Reference check against plain JAX (same high-precision contraction).
    y_ref = (
        jnp.dot(
            x.reshape(-1, in_features),
            weight.T,
            precision=jax.lax.Precision.HIGHEST,
        )
        + bias
    ).reshape(batch, seq, out_features)

    assert y.shape == (batch, seq, out_features)
    assert jnp.allclose(y, y_ref, atol=1e-5, rtol=1e-5), "mismatch vs reference"

    # Exercise the multi-K-tile (reduction) path as well with a larger K.
    K2, N2, M2 = 384, 256, 64
    k1, k2, k3 = jax.random.split(jax.random.PRNGKey(1), 3)
    x2 = jax.random.normal(k1, (M2, K2), dtype=jnp.float32)
    w2 = jax.random.normal(k2, (N2, K2), dtype=jnp.float32) * 0.05
    b2 = jax.random.normal(k3, (N2,), dtype=jnp.float32)
    y2 = linear_forward(x2, w2, b2)
    jax.block_until_ready(y2)
    y2_ref = jnp.dot(x2, w2.T, precision=jax.lax.Precision.HIGHEST) + b2
    assert jnp.allclose(y2, y2_ref, atol=1e-4, rtol=1e-4), "mismatch (multi-K)"

    print("KERNEL_OK")
</pallas_src>

<mosaic_0001>
module attributes {stable_mosaic.version = 11 : i64} {
  func.func @_linear_kernel_single_k(%arg0: i32, %arg1: i32, %arg2: memref<16x128xf32, #tpu.memory_space<vmem>>, %arg3: memref<128x128xf32, #tpu.memory_space<vmem>>, %arg4: memref<1x128xf32, #tpu.memory_space<vmem>>, %arg5: memref<16x128xf32, #tpu.memory_space<vmem>>) attributes {dimension_semantics = [#tpu.dimension_semantics<parallel>, #tpu.dimension_semantics<parallel>], iteration_bounds = array<i64: 1, 1>, scalar_prefetch = 0 : i64, scratch_operands = 0 : i64, tpu.core_type = #tpu.core_type<tc>, window_params = [{transform_indices = @transform_0, window_bounds = array<i64: 16, 128>}, {transform_indices = @transform_1, window_bounds = array<i64: 128, 128>}, {transform_indices = @transform_2, window_bounds = array<i64: 1, 128>}, {transform_indices = @transform_3, window_bounds = array<i64: 16, 128>}]} {
    %c0 = arith.constant 0 : index
    %c0_0 = arith.constant 0 : index
    %0 = vector.load %arg2[%c0, %c0_0] : memref<16x128xf32, #tpu.memory_space<vmem>>, vector<16x128xf32>
    %c0_1 = arith.constant 0 : index
    %c0_2 = arith.constant 0 : index
    %1 = vector.load %arg3[%c0_1, %c0_2] : memref<128x128xf32, #tpu.memory_space<vmem>>, vector<128x128xf32>
    %cst = arith.constant dense<0.000000e+00> : vector<16x128xf32>
    %2 = tpu.matmul %0, %1, %cst {dimension_numbers = #tpu.dot_dimension_numbers<[1], [1], [0], [0], [0, 0, 1, 0], [], []>, precision = #tpu.contract_precision<fp32>} : vector<16x128xf32>, vector<128x128xf32>, vector<16x128xf32> -> vector<16x128xf32>
    %c0_3 = arith.constant 0 : index
    %c0_4 = arith.constant 0 : index
    %3 = vector.load %arg4[%c0_3, %c0_4] : memref<1x128xf32, #tpu.memory_space<vmem>>, vector<1x128xf32>
    %4 = vector.broadcast %3 : vector<1x128xf32> to vector<16x128xf32>
    %5 = arith.addf %2, %4 : vector<16x128xf32>
    %c0_5 = arith.constant 0 : index
    %c0_6 = arith.constant 0 : index
    %6 = vector.load %arg5[%c0_5, %c0_6] : memref<16x128xf32, #tpu.memory_space<vmem>>, vector<16x128xf32>
    tpu.vector_store %arg5[%c0_5, %c0_6], %5 {strides = array<i32>} : memref<16x128xf32, #tpu.memory_space<vmem>>, vector<16x128xf32>,
    return
  }
  func.func @transform_0(%arg0: i32, %arg1: i32) -> (i32, i32) {
    %c0_i32 = arith.constant 0 : i32
    %c0_i32_0 = arith.constant 0 : i32
    return %arg0, %c0_i32 : i32, i32
  }
  func.func @transform_1(%arg0: i32, %arg1: i32) -> (i32, i32) {
    %c0_i32 = arith.constant 0 : i32
    %c0_i32_0 = arith.constant 0 : i32
    return %arg1, %c0_i32 : i32, i32
  }
  func.func @transform_2(%arg0: i32, %arg1: i32) -> (i32, i32) {
    %c0_i32 = arith.constant 0 : i32
    %c0_i32_0 = arith.constant 0 : i32
    return %c0_i32, %arg1 : i32, i32
  }
  func.func @transform_3(%arg0: i32, %arg1: i32) -> (i32, i32) {
    %c0_i32 = arith.constant 0 : i32
    return %arg0, %arg1 : i32, i32
  }
}

</mosaic_0001>

<bundles_post_ra>
// kernel: tpu_custom_call.1
= control target key start
LH: loop header
LB: loop body
LE: loop exit
PB: predicated region body
PF: predicated region fallthrough
CT: control target
= control target key end

     0   :  { %8 = vsyncpa [#allocation3], 0  ;;  %s1643_s0 = inlined_call_operand.hbm [shape: f32[16,128], index: 0, kind: input, shape index: {}]   ;;  %s1644_s1 = inlined_call_operand.hbm [shape: f32[128,128], index: 1, kind: input, shape index: {}]   ;;  %s1645_s2 = inlined_call_operand.vmem [shape: f32[1,128], index: 2, kind: input, shape index: {}]   ;;  %s1646_s3 = inlined_call_operand.hbm [shape: f32[16,128], index: 3, kind: output, shape index: {}]  }
   0x1   :  { %9 = vsyncpa [#allocation6], 0 }
   0x2   :  { %10 = vsyncpa [#allocation4], 0  ;;  %s1372_s12 = smov [#allocation2]   ;;  %s1300_s16 = scalar_lea.hbm %s1643_s0, 256 }
   0x3   :  { %s16_s13 = sshll.u32 %s1372_s12, 4  ;;  %p1301_p0 = scmp.ne.s32.totalorder %s1643_s0, %s1300_s16  ;;  %s17_s13 = int_to_ptr.vmem [resolvable:$true] %s16_s13 }
   0x4   :  { %p1304_p1 = scmp.lt.u32.totalorder %s1300_s16, %s1643_s0 }
   0x6   :  { %p1306_p2 = pnand %p1304_p1, %p1301_p0 }
   0x8   :  { %1309 = shalt.err (!%p1306_p2)
}
   0x9   :  { %s1310_s21 = scalar_lea.vmem %s17_s13, 256  ;;  %p1315_p4 = scmp.lt.s32.totalorder %s17_s13, %s17_s13 }
   0xa   :  { %p1311_p3 = scmp.ne.s32.totalorder %s17_s13, %s1310_s21  ;;  %p1316_p5 = scmp.lt.s32.totalorder %s1310_s21, %s1310_s21 }
   0xc   :  { %p1317_p6 = por %p1316_p5, %p1315_p4 }
   0xe   :  { %p1318_p7 = pnand %p1317_p6, %p1311_p3 }
  0x10   :  { %1321 = shalt.err (!%p1318_p7)
}
  0x11   :  { %s1373_s22 = smov 128   ;;  %s1374_s23 = smov 8  }
  0x12   :  { %22 = dma.hbm_to_vmem [thread:$0]  %s1643_s0, 256, %s17_s13, [#allocation3], %s1373_s22, %s1373_s22, %s1374_s23  }
  0x13   :  { %s1375_s26 = smov [#allocation5]   ;;  %s1322_s30 = scalar_lea.hbm %s1644_s1, 2048 }
  0x14   :  { %s28_s27 = sshll.u32 %s1375_s26, 4  ;;  %p1323_p8 = scmp.ne.s32.totalorder %s1644_s1, %s1322_s30  ;;  %s29_s27 = int_to_ptr.vmem [resolvable:$true] %s28_s27 }
  0x15   :  { %p1326_p9 = scmp.lt.u32.totalorder %s1322_s30, %s1644_s1 }
  0x17   :  { %p1328_p10 = pnand %p1326_p9, %p1323_p8 }
  0x19   :  { %1331 = shalt.err (!%p1328_p10)
}
  0x1a   :  { %s1332_s8 = scalar_lea.vmem %s29_s27, 2048  ;;  %p1337_p12 = scmp.lt.s32.totalorder %s29_s27, %s29_s27 }
  0x1b   :  { %p1333_p11 = scmp.ne.s32.totalorder %s29_s27, %s1332_s8  ;;  %p1338_p13 = scmp.lt.s32.totalorder %s1332_s8, %s1332_s8 }
  0x1d   :  { %p1339_p0 = por %p1338_p13, %p1337_p12 }
  0x1f   :  { %p1340_p1 = pnand %p1339_p0, %p1333_p11 }
  0x21   :  { %1343 = shalt.err (!%p1340_p1)
}
  0x22   :  { %34 = dma.hbm_to_vmem [thread:$0]  %s1644_s1, 2048, %s29_s27, [#allocation6], %s1373_s22, %s1373_s22, %s1374_s23  }
  0x23   :  { %1366 = dma.done.wait [#allocation3], 256  }
  0x24   :  { %1367 = vsyncadd [#allocation3], 4294967040 }
  0x25   :  { %1368 = dma.done.wait [#allocation6], 2048  }
  0x26   :  { %1369 = vsyncadd [#allocation6], 4294965248  ;;  %v45_v0 = vld [vmem:[#allocation5] sm:$0xff]  ;;  %v46_v1 = vld [vmem:[#allocation5 + $0x8] sm:$0xff]  ;;  %s1376_s11 = smov [#allocation7]  }
  0x27   :  { %v47_v2 = vld [vmem:[#allocation5 + $0x10] sm:$0xff]  ;;  %v69_v3 = vand.u32 4294901760, %v45_v0  ;;  %v72_v4 = vand.u32 4294901760, %v46_v1  ;;  %v48_v5 = vld [vmem:[#allocation5 + $0x18] sm:$0xff]  ;;  %v49_v10 = vld [vmem:[#allocation5 + $0x20] sm:$0xff]  ;;  %s759_s12 = sshll.u32 %s1376_s11, 4  ;;  %s760_s12 = int_to_ptr.vmem [resolvable:$true] %s759_s12 }
  0x28   :  { %v75_v6 = vand.u32 4294901760, %v47_v2  ;;  %v78_v7 = vand.u32 4294901760, %v48_v5  ;;  %v50_v11 = vld [vmem:[#allocation5 + $0x28] sm:$0xff]  ;;  %v43_v12 = vld [vmem:[#allocation2] sm:$0xff]  ;;  %v81_v14 = vand.u32 4294901760, %v49_v10  ;;  %v52_v20 = vld [vmem:[#allocation5 + $0x38] sm:$0xff]  ;;  %p1349_p3 = scmp.lt.s32.totalorder %s760_s12, %s760_s12 }
  0x29   :  { %v1427_v8 = vpack.c.bf16 %v72_v4, %v69_v3  ;;  %v1435_v13 = vand.u32 4294901760, %v43_v12  ;;  %v84_v15 = vand.u32 4294901760, %v50_v11  ;;  %v51_v19 = vld [vmem:[#allocation5 + $0x30] sm:$0xff]  ;;  %v90_v24 = vand.u32 4294901760, %v52_v20  ;;  %v53_v26 = vld [vmem:[#allocation5 + $0x40] sm:$0xff]  ;;  %v54_v27 = vld [vmem:[#allocation5 + $0x48] sm:$0xff] }
  0x2a   :  { %v1429_v9 = vpack.c.bf16 %v78_v7, %v75_v6  ;;  %v87_v23 = vand.u32 4294901760, %v51_v19  ;;  %v93_v28 = vand.u32 4294901760, %v53_v26  ;;  %v96_v29 = vand.u32 4294901760, %v54_v27  ;;  %v55_v41 = vld [vmem:[#allocation5 + $0x50] sm:$0xff]  ;;  %v56_v42 = vld [vmem:[#allocation5 + $0x58] sm:$0xff]  ;;  %v57_v51 = vld [vmem:[#allocation5 + $0x60] sm:$0xff] }
  0x2b   :  { %1092 = vmatprep.subr.bf16.mxu1 %v1427_v8  ;;  %1188 = vmatprep.subr.bf16.mxu0 %v1427_v8  ;;  %v1440_v16 = vsub.f32 %v43_v12, %v1435_v13  ;;  %v1443_v18 = vpack.c.bf16 %v84_v15, %v81_v14  ;;  %v1456_v30 = vsub.f32 %v45_v0, %v69_v3  ;;  %v99_v48 = vand.u32 4294901760, %v55_v41  ;;  %v58_v52 = vld [vmem:[#allocation5 + $0x68] sm:$0xff]  ;;  %v59_v59 = vld [vmem:[#allocation5 + $0x70] sm:$0xff]  ;;  %v60_v60 = vld [vmem:[#allocation5 + $0x78] sm:$0xff]  ;;  %s1344_s13 = scalar_lea.vmem %s760_s12, 256 }
  0x2c   :  { %1094 = vmatpush3.bf16.xpose.msra.mxu1 %v1427_v8  ;;  %1190 = vmatpush3.bf16.xpose.msra.mxu0 %v1427_v8  ;;  %v1450_v25 = vpack.c.bf16 %v90_v24, %v87_v23  ;;  %v1458_v31 = vsub.f32 %v46_v1, %v72_v4  ;;  %v1460_v32 = vsub.f32 %v47_v2, %v75_v6  ;;  %v102_v49 = vand.u32 4294901760, %v56_v42  ;;  %v44_v63 = vld [vmem:[#allocation2 + $0x8] sm:$0xff]  ;;  %p1345_p2 = scmp.ne.s32.totalorder %s760_s12, %s1344_s13  ;;  %p1350_p4 = scmp.lt.s32.totalorder %s1344_s13, %s1344_s13 }
  0x2d   :  { %1096 = vmatprep.subr.bf16.mxu1 %v1429_v9  ;;  %1192 = vmatprep.subr.bf16.mxu0 %v1429_v9  ;;  %v151_v17 = vand.u32 4294901760, %v1440_v16  ;;  %v1462_v33 = vsub.f32 %v48_v5, %v78_v7  ;;  %v1464_v34 = vsub.f32 %v49_v10, %v81_v14  ;;  %v1466_v35 = vsub.f32 %v50_v11, %v84_v15 }
  0x2e   :  { %v1470_v36 = vpack.c.bf16 %v1458_v31, %v1456_v30  ;;  %v1472_v37 = vpack.c.bf16 %v96_v29, %v93_v28  ;;  %v1474_v38 = vsub.f32 %v51_v19, %v87_v23  ;;  %v1476_v39 = vsub.f32 %v52_v20, %v90_v24  ;;  %p1351_p5 = por %p1350_p4, %p1349_p3 }
  0x2f   :  { %v152_v21 = vsub.f32 %v1440_v16, %v151_v17  ;;  %1018 = vmatprep.mubr.f32.mxu0 %v151_v17  ;;  %v1480_v40 = vpack.c.bf16 %v1462_v33, %v1460_v32  ;;  %v1482_v43 = vsub.f32 %v53_v26, %v93_v28  ;;  %v1484_v44 = vsub.f32 %v54_v27, %v96_v29 }
  0x30   :  { %v1488_v45 = vpack.c.bf16 %v1466_v35, %v1464_v34  ;;  %v1492_v46 = vpack.c.bf16 %v1476_v39, %v1474_v38  ;;  %v1502_v50 = vpack.c.bf16 %v102_v49, %v99_v48  ;;  %v1504_v53 = vsub.f32 %v55_v41, %v99_v48  ;;  %p1352_p6 = pnand %p1351_p5, %p1345_p2 }
  0x31   :  { %v153_v22 = vand.u32 4294901760, %v152_v21  ;;  %v1498_v47 = vpack.c.bf16 %v1484_v44, %v1482_v43  ;;  %v1506_v54 = vsub.f32 %v56_v42, %v102_v49  ;;  %v105_v56 = vand.u32 4294901760, %v57_v51 }
  0x32   :  { %v108_v57 = vand.u32 4294901760, %v58_v52  ;;  %v111_v1 = vand.u32 4294901760, %v59_v59  ;;  %v114_v2 = vand.u32 4294901760, %v60_v60  ;;  %v172_v3 = vand.u32 4294901760, %v1456_v30 }
  0x33   :  { %913 = vmatprep.mubr.f32.mxu1 %v153_v22  ;;  %v1512_v55 = vpack.c.bf16 %v1506_v54, %v1504_v53  ;;  %v1518_v61 = vsub.f32 %v57_v51, %v105_v56  ;;  %v179_v4 = vand.u32 4294901760, %v1458_v31  ;;  %v1532_v5 = vand.u32 4294901760, %v44_v63 }
  0x34   :  { %1098 = vmatpush3.bf16.xpose.msra.mxu1 %v1429_v9  ;;  %1194 = vmatpush3.bf16.xpose.msra.mxu0 %v1429_v9  ;;  %v1516_v58 = vpack.c.bf16 %v108_v57, %v105_v56  ;;  %v1520_v62 = vsub.f32 %v58_v52, %v108_v57  ;;  %v1534_v6 = vpack.c.bf16 %v114_v2, %v111_v1  ;;  %v186_v20 = vand.u32 4294901760, %v1460_v32 }
  0x35   :  { %1100 = vmatprep.subr.bf16.mxu1 %v1443_v18  ;;  %1196 = vmatprep.subr.bf16.mxu0 %v1443_v18  ;;  %v173_v7 = vsub.f32 %v1456_v30, %v172_v3  ;;  %v180_v10 = vsub.f32 %v1458_v31, %v179_v4  ;;  %v1538_v11 = vsub.f32 %v59_v59, %v111_v1  ;;  %v193_v21 = vand.u32 4294901760, %v1462_v33 }
  0x36   :  { %v1526_v0 = vpack.c.bf16 %v1520_v62, %v1518_v61  ;;  %v1540_v12 = vsub.f32 %v60_v60, %v114_v2  ;;  %v1543_v14 = vsub.f32 %v44_v63, %v1532_v5  ;;  %v1219_v24 = vpack.c.bf16 %v179_v4, %v172_v3 }
  0x37   :  { %v174_v17 = vand.u32 4294901760, %v173_v7  ;;  %v181_v19 = vand.u32 4294901760, %v180_v10  ;;  %v187_v26 = vsub.f32 %v1460_v32, %v186_v20  ;;  %v194_v27 = vsub.f32 %v1462_v33, %v193_v21 }
  0x38   :  { %v1549_v15 = vpack.c.bf16 %v1540_v12, %v1538_v11  ;;  %v161_v22 = vand.u32 4294901760, %v1543_v14  ;;  %v200_v31 = vand.u32 4294901760, %v1464_v34  ;;  %v207_v41 = vand.u32 4294901760, %v1466_v35 }
  0x39   :  { %v1123_v23 = vpack.c.bf16 %v181_v19, %v174_v17  ;;  %v188_v29 = vand.u32 4294901760, %v187_v26  ;;  %v195_v30 = vand.u32 4294901760, %v194_v27  ;;  %v1223_v49 = vpack.c.bf16 %v193_v21, %v186_v20 }
  0x3a   :  { %v162_v28 = vsub.f32 %v1543_v14, %v161_v22  ;;  %v201_v32 = vsub.f32 %v1464_v34, %v200_v31  ;;  %v208_v33 = vsub.f32 %v1466_v35, %v207_v41  ;;  %v214_v56 = vand.u32 4294901760, %v1474_v38 }
  0x3b   :  { %v1127_v48 = vpack.c.bf16 %v195_v30, %v188_v29  ;;  %v221_v57 = vand.u32 4294901760, %v1476_v39  ;;  %v1227_v34 = vpack.c.bf16 %v207_v41, %v200_v31  ;;  %v228_v2 = vand.u32 4294901760, %v1482_v43 }
  0x3c   :  { %1102 = vmatpush3.bf16.xpose.msra.mxu1 %v1443_v18  ;;  %1198 = vmatpush3.bf16.xpose.msra.mxu0 %v1443_v18  ;;  %v163_v42 = vand.u32 4294901760, %v162_v28  ;;  %v202_v51 = vand.u32 4294901760, %v201_v32  ;;  %v209_v52 = vand.u32 4294901760, %v208_v33  ;;  %v215_v35 = vsub.f32 %v1474_v38, %v214_v56 }
  0x3d   :  { %1104 = vmatprep.subr.bf16.mxu1 %v1450_v25  ;;  %1200 = vmatprep.subr.bf16.mxu0 %v1450_v25  ;;  %v222_v60 = vsub.f32 %v1476_v39, %v221_v57  ;;  %v235_v3 = vand.u32 4294901760, %v1484_v44  ;;  %v1231_v7 = vpack.c.bf16 %v221_v57, %v214_v56  ;;  %v229_v10 = vsub.f32 %v1482_v43, %v228_v2 }
  0x3e   :  { %v1131_v59 = vpack.c.bf16 %v209_v52, %v202_v51  ;;  %v216_v63 = vand.u32 4294901760, %v215_v35  ;;  %v242_v19 = vand.u32 4294901760, %v1504_v53  ;;  %v249_v20 = vand.u32 4294901760, %v1506_v54 }
  0x3f   :  { %v223_v1 = vand.u32 4294901760, %v222_v60  ;;  %v236_v17 = vsub.f32 %v1484_v44, %v235_v3  ;;  %v230_v38 = vand.u32 4294901760, %v229_v10  ;;  %v256_v26 = vand.u32 4294901760, %v1518_v61 }
  0x40   :  { %v263_v27 = vand.u32 4294901760, %v1520_v62  ;;  %v1239_v29 = vpack.c.bf16 %v249_v20, %v242_v19  ;;  %v270_v41 = vand.u32 4294901760, %v1538_v11 }
  0x41   :  { %v1135_v4 = vpack.c.bf16 %v223_v1, %v216_v63  ;;  %v237_v39 = vand.u32 4294901760, %v236_v17  ;;  %v257_v30 = vsub.f32 %v1518_v61, %v256_v26 }
  0x42   :  { %v264_v31 = vsub.f32 %v1520_v62, %v263_v27  ;;  %v271_v32 = vsub.f32 %v1538_v11, %v270_v41 }
  0x43   :  { %v1139_v21 = vpack.c.bf16 %v237_v39, %v230_v38 }
  0x44   :  { %1106 = vmatpush3.bf16.xpose.msra.mxu1 %v1450_v25  ;;  %1202 = vmatpush3.bf16.xpose.msra.mxu0 %v1450_v25  ;;  %v272_v61 = vand.u32 4294901760, %v271_v32 }
  0x45   :  { %1108 = vmatprep.subr.bf16.mxu1 %v1472_v37  ;;  %1204 = vmatprep.subr.bf16.mxu0 %v1472_v37 }
  0x4c   :  { %1110 = vmatpush3.bf16.xpose.msra.mxu1 %v1472_v37  ;;  %1206 = vmatpush3.bf16.xpose.msra.mxu0 %v1472_v37 }
  0x4d   :  { %1112 = vmatprep.subr.bf16.mxu1 %v1502_v50  ;;  %1208 = vmatprep.subr.bf16.mxu0 %v1502_v50 }
  0x54   :  { %1114 = vmatpush3.bf16.xpose.msra.mxu1 %v1502_v50  ;;  %1210 = vmatpush3.bf16.xpose.msra.mxu0 %v1502_v50 }
  0x55   :  { %1116 = vmatprep.subr.bf16.mxu1 %v1516_v58  ;;  %1212 = vmatprep.subr.bf16.mxu0 %v1516_v58 }
  0x5c   :  { %1118 = vmatpush3.bf16.xpose.msra.mxu1 %v1516_v58  ;;  %1214 = vmatpush3.bf16.xpose.msra.mxu0 %v1516_v58 }
  0x5d   :  { %1120 = vmatprep.subr.bf16.mxu1 %v1534_v6  ;;  %1216 = vmatprep.subr.bf16.mxu0 %v1534_v6 }
  0x64   :  { %1122 = vmatpush3.bf16.xpose.msra.mxu1 %v1534_v6  ;;  %1218 = vmatpush3.bf16.xpose.msra.mxu0 %v1534_v6 }
  0x65   :  { %1124 = vmatprep.subr.bf16.mxu1 %v1123_v23  ;;  %1220 = vmatprep.subr.bf16.mxu0 %v1219_v24 }
  0x6b   :  { %914 = vmatmul.mubr.f32.vlgmr.msra.gmra.mrb[0].mxu1 %v163_v42  ;;  %1019 = vmatmul.mubr.f32.vlgmr.msra.gmra.mrb[0].mxu0 %v161_v22  ;;  %v1235_v22 = vpack.c.bf16 %v235_v3, %v228_v2  ;;  %v277_v42 = vand.u32 4294901760, %v1540_v12 }
  0x6c   :  { %1126 = vmatpush3.bf16.xpose.msra.mxu1 %v1123_v23  ;;  %1222 = vmatpush3.bf16.xpose.msra.mxu0 %v1219_v24  ;;  %v243_v23 = vsub.f32 %v1504_v53, %v242_v19  ;;  %v250_v24 = vsub.f32 %v1506_v54, %v249_v20  ;;  %v258_v53 = vand.u32 4294901760, %v257_v30  ;;  %v265_v54 = vand.u32 4294901760, %v264_v31 }
  0x6d   :  { %1128 = vmatprep.subr.bf16.mxu1 %v1127_v48  ;;  %1224 = vmatprep.subr.bf16.mxu0 %v1223_v49  ;;  %v278_v33 = vsub.f32 %v1540_v12, %v277_v42  ;;  %v1247_v52 = vpack.c.bf16 %v277_v42, %v270_v41 }
  0x6e   :  { %948 = vmatprep.mubr.f32.mxu1 %v1435_v13  ;;  %1053 = vmatprep.mubr.f32.mxu0 %v1435_v13  ;;  %v244_v43 = vand.u32 4294901760, %v243_v23  ;;  %v251_v44 = vand.u32 4294901760, %v250_v24 }
  0x6f   :  { %v279_v62 = vand.u32 4294901760, %v278_v33 }
  0x70   :  { %v1143_v28 = vpack.c.bf16 %v251_v44, %v244_v43 }
  0x71   :  { %v1151_v51 = vpack.c.bf16 %v279_v62, %v272_v61 }
  0x74   :  { %1130 = vmatpush3.bf16.xpose.msra.mxu1 %v1127_v48  ;;  %1226 = vmatpush3.bf16.xpose.msra.mxu0 %v1223_v49  ;;  %v1147_v48 = vpack.c.bf16 %v265_v54, %v258_v53  ;;  %v1243_v49 = vpack.c.bf16 %v263_v27, %v256_v26 }
  0x75   :  { %1132 = vmatprep.subr.bf16.mxu1 %v1131_v59  ;;  %1228 = vmatprep.subr.bf16.mxu0 %v1227_v34 }
  0x7c   :  { %1134 = vmatpush3.bf16.xpose.msra.mxu1 %v1131_v59  ;;  %1230 = vmatpush3.bf16.xpose.msra.mxu0 %v1227_v34 }
  0x7d   :  { %1136 = vmatprep.subr.bf16.mxu1 %v1135_v4  ;;  %1232 = vmatprep.subr.bf16.mxu0 %v1231_v7 }
  0x84   :  { %1138 = vmatpush3.bf16.xpose.msra.mxu1 %v1135_v4  ;;  %1234 = vmatpush3.bf16.xpose.msra.mxu0 %v1231_v7 }
  0x85   :  { %1140 = vmatprep.subr.bf16.mxu1 %v1139_v21  ;;  %1236 = vmatprep.subr.bf16.mxu0 %v1235_v22 }
  0x8c   :  { %1142 = vmatpush3.bf16.xpose.msra.mxu1 %v1139_v21  ;;  %1238 = vmatpush3.bf16.xpose.msra.mxu0 %v1235_v22 }
  0x8d   :  { %1144 = vmatprep.subr.bf16.mxu1 %v1143_v28  ;;  %1240 = vmatprep.subr.bf16.mxu0 %v1239_v29 }
  0x94   :  { %1146 = vmatpush3.bf16.xpose.msra.mxu1 %v1143_v28  ;;  %1242 = vmatpush3.bf16.xpose.msra.mxu0 %v1239_v29 }
  0x95   :  { %1148 = vmatprep.subr.bf16.mxu1 %v1147_v48  ;;  %1244 = vmatprep.subr.bf16.mxu0 %v1243_v49 }
  0x9c   :  { %1150 = vmatpush3.bf16.xpose.msra.mxu1 %v1147_v48  ;;  %1246 = vmatpush3.bf16.xpose.msra.mxu0 %v1243_v49 }
  0x9d   :  { %1152 = vmatprep.subr.bf16.mxu1 %v1151_v51  ;;  %1248 = vmatprep.subr.bf16.mxu0 %v1247_v52 }
  0xa4   :  { %1154 = vmatpush3.bf16.xpose.msra.mxu1 %v1151_v51  ;;  %1250 = vmatpush3.bf16.xpose.msra.mxu0 %v1247_v52 }
  0xa5   :  { %1156 = vmatprep.subr.bf16.mxu1 %v1470_v36  ;;  %1252 = vmatprep.subr.bf16.mxu0 %v1427_v8 }
  0xab   :  { %949 = vmatmul.mubr.f32.vlgmr.msra.gmra.mrb[0].mxu1 %v1532_v5  ;;  %1054 = vmatmul.mubr.f32.vlgmr.msra.gmra.mrb[0].mxu0 %v1532_v5 }
  0xac   :  { %1158 = vmatpush3.bf16.xpose.msra.mxu1 %v1470_v36  ;;  %1254 = vmatpush3.bf16.xpose.msra.mxu0 %v1427_v8  ;;  %v772_v8 = vld [vmem:[%s1645_s2] ss:$0 sm:$0xff] }
  0xad   :  { %1160 = vmatprep.subr.bf16.mxu1 %v1480_v40  ;;  %1256 = vmatprep.subr.bf16.mxu0 %v1429_v9 }
  0xae   :  { %983 = vmatprep.mubr.f32.mxu1 %v1440_v16  ;;  %1088 = vmatprep.mubr.f32.mxu0 %v1435_v13 }
  0xb4   :  { %1162 = vmatpush3.bf16.xpose.msra.mxu1 %v1480_v40  ;;  %1258 = vmatpush3.bf16.xpose.msra.mxu0 %v1429_v9 }
  0xb5   :  { %1164 = vmatprep.subr.bf16.mxu1 %v1488_v45  ;;  %1260 = vmatprep.subr.bf16.mxu0 %v1443_v18 }
  0xbc   :  { %1166 = vmatpush3.bf16.xpose.msra.mxu1 %v1488_v45  ;;  %1262 = vmatpush3.bf16.xpose.msra.mxu0 %v1443_v18 }
  0xbd   :  { %1168 = vmatprep.subr.bf16.mxu1 %v1492_v46  ;;  %1264 = vmatprep.subr.bf16.mxu0 %v1450_v25 }
  0xc4   :  { %1170 = vmatpush3.bf16.xpose.msra.mxu1 %v1492_v46  ;;  %1266 = vmatpush3.bf16.xpose.msra.mxu0 %v1450_v25 }
  0xc5   :  { %1172 = vmatprep.subr.bf16.mxu1 %v1498_v47  ;;  %1268 = vmatprep.subr.bf16.mxu0 %v1472_v37 }
  0xcc   :  { %1174 = vmatpush3.bf16.xpose.msra.mxu1 %v1498_v47  ;;  %1270 = vmatpush3.bf16.xpose.msra.mxu0 %v1472_v37 }
  0xcd   :  { %1176 = vmatprep.subr.bf16.mxu1 %v1512_v55  ;;  %1272 = vmatprep.subr.bf16.mxu0 %v1502_v50 }
  0xd4   :  { %1178 = vmatpush3.bf16.xpose.msra.mxu1 %v1512_v55  ;;  %1274 = vmatpush3.bf16.xpose.msra.mxu0 %v1502_v50 }
  0xd5   :  { %1180 = vmatprep.subr.bf16.mxu1 %v1526_v0  ;;  %1276 = vmatprep.subr.bf16.mxu0 %v1516_v58 }
  0xdc   :  { %1182 = vmatpush3.bf16.xpose.msra.mxu1 %v1526_v0  ;;  %1278 = vmatpush3.bf16.xpose.msra.mxu0 %v1516_v58 }
  0xdd   :  { %1184 = vmatprep.subr.bf16.mxu1 %v1549_v15  ;;  %1280 = vmatprep.subr.bf16.mxu0 %v1534_v6 }
  0xe4   :  { %1186 = vmatpush3.bf16.xpose.msra.mxu1 %v1549_v15  ;;  %1282 = vmatpush3.bf16.xpose.msra.mxu0 %v1534_v6 }
  0xeb   :  { %984 = vmatmul.mubr.f32.vlgmr.msra.gmra.mrb[0].mxu1 %v1543_v14  ;;  %1089 = vmatmul.mubr.f32.vlgmr.msra.gmra.mrb[0].mxu0 %v1532_v5 }
 0x1be   :  { %v985_v9 = vpop.f32.mrb[0].mxu1  ;;  %v1090_v13 = vpop.f32.mrb[0].mxu0 }
 0x1bf   :  { %v1283_v16 = vadd.f32 %v985_v9, %v772_v8  ;;  %v426_v18 = vpop.f32.mrb[1].mxu1  ;;  %v742_v25 = vpop.f32.mrb[1].mxu0 }
 0x1c0   :  { %v1285_v36 = vadd.f32 %v772_v8, %v426_v18 }
 0x1c1   :  { %v1284_v37 = vadd.f32 %v1283_v16, %v1090_v13 }
 0x1c2   :  { %v1286_v40 = vadd.f32 %v1285_v36, %v742_v25 }
 0x1c3   :  { %753 = vst [vmem:[#allocation7 + $0x8] sm:$0xff] %v1284_v37 }
 0x1c4   :  { %752 = vst [vmem:[#allocation7] sm:$0xff] %v1286_v40 }
 0x1c5   :  { %1355 = shalt.err (!%p1352_p6)
}
 0x1c6   :  { %s1356_s15 = scalar_lea.hbm %s1646_s3, 256 }
 0x1c7   :  { %p1357_p7 = scmp.ne.s32.totalorder %s1646_s3, %s1356_s15  ;;  %p1360_p8 = scmp.lt.u32.totalorder %s1356_s15, %s1646_s3 }
 0x1c9   :  { %p1362_p9 = pnand %p1360_p8, %p1357_p7 }
 0x1cb   :  { %1365 = shalt.err (!%p1362_p9)
}
 0x1cc   :  { %765 = dma.vmem_to_hbm [thread:$0]  %s760_s12, 256, %s1646_s3, [#allocation4], %s1373_s22, %s1373_s22, %s1374_s23  }
 0x1cd   :  { %1370 = dma.done.wait [#allocation4], 256  }
 0x1ce   :  { %1371 = vsyncadd [#allocation4], 4294967040 }
 0x1cf   :  { %769 = vsyncpa [#allocation3], 1 }
 0x1d0   :  { %770 = vsyncpa [#allocation6], 1 }
 0x1d1   :  { %771 = vsyncpa [#allocation4], 1 }

</bundles_post_ra>
